<compile_context>
chip_gen: v5e
topology: v5e:2x2
jax: 0.10.0
libtpu: 0.0.40
codegen_flags: <defaults>
</compile_context>

<pallas_src>
import functools

import jax
import jax.numpy as jnp
from jax.experimental import pallas as pl
from jax.experimental.pallas import tpu as pltpu

EPS = 1e-5


# --------------------------------------------------------------------------
# Kernels
# --------------------------------------------------------------------------
def _depthwise(x, dw, K, W):
    """VALID depthwise conv over a lane-flattened spatial axis via XLU rolls.

    x : (..., HW) input with spatial flattened on the lane axis.
    dw: (rows, K*K) per-channel taps (BN1 scale pre-folded), taps on lanes.
    Positions whose taps wrap around the flattened axis are garbage and are
    cropped by the wrapper.  Uses 2*(K-1) rolls instead of K*K-1.
    """
    lane_axis = x.ndim - 1
    HW = x.shape[-1]

    def wslice(t):
        w = dw[:, t:t + 1]                       # (rows, 1), lane-broadcast
        return w if x.ndim == 2 else w[None]     # (1, rows, 1) for 3-D blocks

    # column-shifted copies: xc[c][p] = x[p + c]
    xc = [x] + [pltpu.roll(x, shift=HW - c, axis=lane_axis) for c in range(1, K)]
    acc = None
    for r in range(K):
        row = xc[0] * wslice(r * K)
        for c in range(1, K):
            row = row + xc[c] * wslice(r * K + c)
        if r:
            # roll the weighted row-sum by +r*W (weights are lane-invariant)
            row = pltpu.roll(row, shift=HW - r * W, axis=lane_axis)
        acc = row if acc is None else acc + row
    return acc


def _dsconv_kernel_packed(x_ref, dw_ref, b1_ref, pw_ref, b2_ref, o_ref, *, K, W):
    # Sublane-packed layout (Cin < 8):
    #   x_ref : (B*Cin, H*W)     batch*channels on sublanes, spatial on lanes
    #   dw_ref: (B*Cin, K*K)     depthwise taps (BN1 scale folded), tiled over B
    #   b1_ref: (B*Cin, 1)
    #   pw_ref: (B*Cout, B*Cin)  block-diagonal pointwise weights (BN2 folded)
    #   b2_ref: (B*Cout, 1)
    #   o_ref : (B*Cout, H*W)
    x = x_ref[...]
    acc = _depthwise(x, dw_ref[...], K, W)
    y = jnp.maximum(acc + b1_ref[...], 0.0)                       # (B*Cin, HW)
    # 1x1 conv as ONE block-diagonal matmul on the (otherwise idle) MXU.
    z = jnp.dot(pw_ref[...], y, preferred_element_type=jnp.float32)
    o_ref[...] = jnp.maximum(z + b2_ref[...], 0.0).astype(o_ref.dtype)


def _dsconv_kernel_wide(x_ref, dw_ref, b1_ref, pw_ref, b2_ref, o_ref, *, K, W):
    # Wide-channel layout (Cin >= 8):
    #   x_ref : (B, Cin, H*W)
    #   dw_ref: (Cin, K*K)   f32, BN1 scale folded
    #   b1_ref: (Cin, 1)
    #   pw_ref: (Cout, Cin)  bf16, BN2 scale folded
    #   b2_ref: (Cout, 1)
    #   o_ref : (B, Cout, H*W)
    x = x_ref[...]
    B = x.shape[0]
    acc = _depthwise(x, dw_ref[...], K, W)
    y = jnp.maximum(acc + b1_ref[...][None], 0.0)                 # (B, Cin, HW)
    # Pointwise over all B images as one batched MXU matmul, bf16 operands,
    # f32 accumulation (no per-image Python loop, no in-kernel transposes).
    pwb = jnp.broadcast_to(pw_ref[...][None], (B,) + pw_ref.shape)   # (B,Cout,Cin)
    z = jax.lax.dot_general(pwb, y.astype(jnp.bfloat16),
                            (((2,), (1,)), ((0,), (0,))),
                            preferred_element_type=jnp.float32)      # (B,Cout,HW)
    o_ref[...] = jnp.maximum(z + b2_ref[...][None], 0.0).astype(o_ref.dtype)


# --------------------------------------------------------------------------
# Wrapper
# --------------------------------------------------------------------------
def _pick_batch_tile(n, cin, cout, hw, *, packed, budget_bytes=8 << 20):
    """Images per grid step.

    Largest divisor of n whose per-step working set (double-buffered in/out
    DMA tiles + ~5 input-sized f32 temporaries + the pointwise result) fits
    the budget, preferring >=2 grid steps (v7x megacore) and, for the packed
    layout, 8-sublane alignment of the block's leading dim.
    """
    in_img = cin * hw * 4
    out_img = cout * hw * 4
    per_img = in_img * 7 + out_img * 3      # 2x DMA + ~5 temps in; 2x DMA + z out
    cap = max(1, budget_bytes // max(per_img, 1))

    def aligned(b):
        if not packed:
            return True
        return ((b * cin) % 8 == 0 or b == n) and ((b * cout) % 8 == 0 or b == n)

    divs = [b for b in range(1, n + 1) if n % b == 0 and aligned(b)]
    fits = [b for b in divs if b <= cap] or divs[:1]
    multi = [b for b in fits if n // b >= 2]     # keep both TCs busy on v7x
    return (max(multi) if multi else max(fits)), per_img


def depth_separable_conv2d_block(x_nchw, params):
    """x_nchw: (N, Cin, H, W) float32. Returns (N, Cout, Ho, Wo) float32."""
    (dw_w, dw_b, g1, be1, m1, v1, pw_w, pw_b, g2, be2, m2, v2) = params

    N, Cin, H, W = x_nchw.shape
    Cout = pw_w.shape[0]
    K = dw_w.shape[-1]
    Ho, Wo = H - K + 1, W - K + 1
    HW = H * W

    # ---- fold BN (eval mode) scales into the conv weights; keep only biases ----
    s1 = g1 / jnp.sqrt(v1 + EPS)                                  # (Cin,)
    b1 = (dw_b - m1) * s1 + be1                                   # (Cin,)
    s2 = g2 / jnp.sqrt(v2 + EPS)                                  # (Cout,)
    b2 = (pw_b - m2) * s2 + be2                                   # (Cout,)

    dww = dw_w[:, 0, :, :].reshape(Cin, K * K) * s1[:, None]      # (Cin, K*K)
    pww = pw_w[:, :, 0, 0] * s2[:, None]                          # (Cout, Cin)

    packed = Cin < 8                      # pack batch+channels onto sublanes
    B, per_img = _pick_batch_tile(N, Cin, Cout, HW, packed=packed)

    weight_bytes = (B * Cout) * (B * Cin) * 4 if packed else Cout * Cin * 2
    need = B * per_img + weight_bytes + (1 << 20)
    vmem_limit = int(min(32 << 20, max(16 << 20, 2 * need)))
    cparams = pltpu.CompilerParams(dimension_semantics=("parallel",),
                                   vmem_limit_bytes=vmem_limit)

    if packed:
        # (N*Cin, H*W) -> (N*Cout, H*W): full 8-sublane vregs even at Cin=4.
        x_flat = x_nchw.reshape(N * Cin, HW)                      # contiguous, free
        dw_t = jnp.tile(dww, (B, 1))                              # (B*Cin, K*K)
        b1_t = jnp.tile(b1[:, None], (B, 1))                      # (B*Cin, 1)
        pw_bd = jnp.kron(jnp.eye(B, dtype=pww.dtype), pww)        # (B*Cout, B*Cin)
        b2_t = jnp.tile(b2[:, None], (B, 1))                      # (B*Cout, 1)

        out_flat = pl.pallas_call(
            functools.partial(_dsconv_kernel_packed, K=K, W=W),
            out_shape=jax.ShapeDtypeStruct((N * Cout, HW), jnp.float32),
            grid_spec=pltpu.PrefetchScalarGridSpec(
                num_scalar_prefetch=0,
                grid=(N // B,),
                in_specs=[
                    pl.BlockSpec((B * Cin, HW), lambda n: (n, 0)),
                    pl.BlockSpec((B * Cin, K * K), lambda n: (0, 0)),
                    pl.BlockSpec((B * Cin, 1), lambda n: (0, 0)),
                    pl.BlockSpec((B * Cout, B * Cin), lambda n: (0, 0)),
                    pl.BlockSpec((B * Cout, 1), lambda n: (0, 0)),
                ],
                out_specs=pl.BlockSpec((B * Cout, HW), lambda n: (n, 0)),
            ),
            compiler_params=cparams,
        )(x_flat, dw_t, b1_t, pw_bd, b2_t)
    else:
        x_flat = x_nchw.reshape(N, Cin, HW)                       # contiguous, free
        out_flat = pl.pallas_call(
            functools.partial(_dsconv_kernel_wide, K=K, W=W),
            out_shape=jax.ShapeDtypeStruct((N, Cout, HW), jnp.float32),
            grid_spec=pltpu.PrefetchScalarGridSpec(
                num_scalar_prefetch=0,
                grid=(N // B,),
                in_specs=[
                    pl.BlockSpec((B, Cin, HW), lambda n: (n, 0, 0)),
                    pl.BlockSpec((Cin, K * K), lambda n: (0, 0)),
                    pl.BlockSpec((Cin, 1), lambda n: (0, 0)),
                    pl.BlockSpec((Cout, Cin), lambda n: (0, 0)),
                    pl.BlockSpec((Cout, 1), lambda n: (0, 0)),
                ],
                out_specs=pl.BlockSpec((B, Cout, HW), lambda n: (n, 0, 0)),
            ),
            compiler_params=cparams,
        )(x_flat, dww, b1[:, None], pww.astype(jnp.bfloat16), b2[:, None])

    # Kernel stores the padded H*W footprint lane-dense (full-vreg stores);
    # crop the valid Ho x Wo window here (see TODO about the extra HBM pass).
    return out_flat.reshape(N, Cout, H, W)[:, :, :Ho, :Wo]


# --------------------------------------------------------------------------
# Pure-JAX reference (BN in eval mode), mirroring the PyTorch forward.
# --------------------------------------------------------------------------
def _reference(x, params):
    (dw_w, dw_b, g1, be1, m1, v1, pw_w, pw_b, g2, be2, m2, v2) = params
    Cin = x.shape[1]

    def bn(y, g, b, m, v):
        return (y - m[None, :, None, None]) / jnp.sqrt(v[None, :, None, None] + EPS) \
            * g[None, :, None, None] + b[None, :, None, None]

    y = jax.lax.conv_general_dilated(
        x, dw_w, (1, 1), "VALID",
        dimension_numbers=("NCHW", "OIHW", "NCHW"),
        feature_group_count=Cin,
    ) + dw_b[None, :, None, None]
    y = jnp.maximum(bn(y, g1, be1, m1, v1), 0.0)

    z = jax.lax.conv_general_dilated(
        y, pw_w, (1, 1), "VALID",
        dimension_numbers=("NCHW", "OIHW", "NCHW"),
    ) + pw_b[None, :, None, None]
    z = jnp.maximum(bn(z, g2, be2, m2, v2), 0.0)
    return z


if __name__ == "__main__":
    key = jax.random.PRNGKey(0)

    def make_params(k, cin, cout, ksz):
        ks = jax.random.split(k, 12)
        dw_w = jax.random.normal(ks[0], (cin, 1, ksz, ksz), jnp.float32) * 0.2
        dw_b = jax.random.normal(ks[1], (cin,), jnp.float32) * 0.1
        pw_w = jax.random.normal(ks[2], (cout, cin, 1, 1), jnp.float32) * 0.2
        pw_b = jax.random.normal(ks[3], (cout,), jnp.float32) * 0.1
        g1 = 1.0 + 0.1 * jax.random.normal(ks[4], (cin,), jnp.float32)
        be1 = 0.1 * jax.random.normal(ks[5], (cin,), jnp.float32)
        m1 = 0.1 * jax.random.normal(ks[6], (cin,), jnp.float32)
        v1 = 0.5 + jnp.abs(jax.random.normal(ks[7], (cin,), jnp.float32))
        g2 = 1.0 + 0.1 * jax.random.normal(ks[8], (cout,), jnp.float32)
        be2 = 0.1 * jax.random.normal(ks[9], (cout,), jnp.float32)
        m2 = 0.1 * jax.random.normal(ks[10], (cout,), jnp.float32)
        v2 = 0.5 + jnp.abs(jax.random.normal(ks[11], (cout,), jnp.float32))
        return (dw_w, dw_b, g1, be1, m1, v1, pw_w, pw_b, g2, be2, m2, v2)

    k1, k2, k3, k4 = jax.random.split(key, 4)

    # ---- small-channel (sublane-packed, f32-MXU) path: the module's spec shape ----
    N, Cin, H, W, Cout, K = 2, 4, 16, 16, 8, 3
    x = jax.random.normal(k1, (N, Cin, H, W), jnp.float32)
    params = make_params(k2, Cin, Cout, K)

    out = jax.block_until_ready(depth_separable_conv2d_block(x, params))
    ref = _reference(x, params)
    assert out.shape == (N, Cout, H - K + 1, W - K + 1), out.shape
    assert jnp.allclose(out, ref, atol=1e-3, rtol=1e-3), \
        float(jnp.max(jnp.abs(out - ref)))

    # ---- wide-channel (bf16-MXU pointwise) path ----
    N2, Cin2, Cout2 = 2, 32, 64
    x2 = jax.random.normal(k3, (N2, Cin2, H, W), jnp.float32)
    params2 = make_params(k4, Cin2, Cout2, K)

    out2 = jax.block_until_ready(depth_separable_conv2d_block(x2, params2))
    ref2 = _reference(x2, params2)
    assert out2.shape == (N2, Cout2, H - K + 1, W - K + 1), out2.shape
    # bf16 pointwise operands (f32 accumulation) => looser tolerance vs f32 ref
    assert jnp.allclose(out2, ref2, atol=5e-2, rtol=5e-2), \
        float(jnp.max(jnp.abs(out2 - ref2)))

    print("KERNEL_OK")
</pallas_src>

<mosaic_0001>
module attributes {stable_mosaic.version = 11 : i64} {
  func.func @_dsconv_kernel_packed(%arg0: i32, %arg1: memref<8x256xf32, #tpu.memory_space<vmem>>, %arg2: memref<8x9xf32, #tpu.memory_space<vmem>>, %arg3: memref<8x1xf32, #tpu.memory_space<vmem>>, %arg4: memref<16x8xf32, #tpu.memory_space<vmem>>, %arg5: memref<16x1xf32, #tpu.memory_space<vmem>>, %arg6: memref<16x256xf32, #tpu.memory_space<vmem>>) attributes {dimension_semantics = [#tpu.dimension_semantics<parallel>], iteration_bounds = array<i64: 1>, scalar_prefetch = 0 : i64, scratch_operands = 0 : i64, tpu.core_type = #tpu.core_type<tc>, window_params = [{transform_indices = @transform_0, window_bounds = array<i64: 8, 256>}, {pipeline_mode = #tpu.pipeline_mode<synchronous>, transform_indices = @transform_1, window_bounds = array<i64: 8, 9>}, {pipeline_mode = #tpu.pipeline_mode<synchronous>, transform_indices = @transform_2, window_bounds = array<i64: 8, 1>}, {pipeline_mode = #tpu.pipeline_mode<synchronous>, transform_indices = @transform_3, window_bounds = array<i64: 16, 8>}, {pipeline_mode = #tpu.pipeline_mode<synchronous>, transform_indices = @transform_4, window_bounds = array<i64: 16, 1>}, {transform_indices = @transform_5, window_bounds = array<i64: 16, 256>}]} {
    %c0 = arith.constant 0 : index
    %c0_0 = arith.constant 0 : index
    %0 = vector.load %arg1[%c0, %c0_0] : memref<8x256xf32, #tpu.memory_space<vmem>>, vector<8x256xf32>
    %c0_1 = arith.constant 0 : index
    %c0_2 = arith.constant 0 : index
    %1 = vector.load %arg2[%c0_1, %c0_2] : memref<8x9xf32, #tpu.memory_space<vmem>>, vector<8x9xf32>
    %c255_i32 = arith.constant 255 : i32
    %2 = tpu.dynamic_rotate %0 by %c255_i32 dim 1 : vector<8x256xf32>, i32 -> vector<8x256xf32>
    %c254_i32 = arith.constant 254 : i32
    %3 = tpu.dynamic_rotate %0 by %c254_i32 dim 1 : vector<8x256xf32>, i32 -> vector<8x256xf32>
    %4 = vector.extract_strided_slice %1 {offsets = [0, 0], sizes = [8, 1], strides = [1, 1]} : vector<8x9xf32> to vector<8x1xf32>
    %5 = vector.broadcast %4 : vector<8x1xf32> to vector<8x256xf32>
    %6 = arith.mulf %0, %5 : vector<8x256xf32>
    %7 = vector.extract_strided_slice %1 {offsets = [0, 1], sizes = [8, 1], strides = [1, 1]} : vector<8x9xf32> to vector<8x1xf32>
    %8 = vector.broadcast %7 : vector<8x1xf32> to vector<8x256xf32>
    %9 = arith.mulf %2, %8 : vector<8x256xf32>
    %10 = arith.addf %6, %9 : vector<8x256xf32>
    %11 = vector.extract_strided_slice %1 {offsets = [0, 2], sizes = [8, 1], strides = [1, 1]} : vector<8x9xf32> to vector<8x1xf32>
    %12 = vector.broadcast %11 : vector<8x1xf32> to vector<8x256xf32>
    %13 = arith.mulf %3, %12 : vector<8x256xf32>
    %14 = arith.addf %10, %13 : vector<8x256xf32>
    %15 = vector.extract_strided_slice %1 {offsets = [0, 3], sizes = [8, 1], strides = [1, 1]} : vector<8x9xf32> to vector<8x1xf32>
    %16 = vector.broadcast %15 : vector<8x1xf32> to vector<8x256xf32>
    %17 = arith.mulf %0, %16 : vector<8x256xf32>
    %18 = vector.extract_strided_slice %1 {offsets = [0, 4], sizes = [8, 1], strides = [1, 1]} : vector<8x9xf32> to vector<8x1xf32>
    %19 = vector.broadcast %18 : vector<8x1xf32> to vector<8x256xf32>
    %20 = arith.mulf %2, %19 : vector<8x256xf32>
    %21 = arith.addf %17, %20 : vector<8x256xf32>
    %22 = vector.extract_strided_slice %1 {offsets = [0, 5], sizes = [8, 1], strides = [1, 1]} : vector<8x9xf32> to vector<8x1xf32>
    %23 = vector.broadcast %22 : vector<8x1xf32> to vector<8x256xf32>
    %24 = arith.mulf %3, %23 : vector<8x256xf32>
    %25 = arith.addf %21, %24 : vector<8x256xf32>
    %c240_i32 = arith.constant 240 : i32
    %26 = tpu.dynamic_rotate %25 by %c240_i32 dim 1 : vector<8x256xf32>, i32 -> vector<8x256xf32>
    %27 = arith.addf %14, %26 : vector<8x256xf32>
    %28 = vector.extract_strided_slice %1 {offsets = [0, 6], sizes = [8, 1], strides = [1, 1]} : vector<8x9xf32> to vector<8x1xf32>
    %29 = vector.broadcast %28 : vector<8x1xf32> to vector<8x256xf32>
    %30 = arith.mulf %0, %29 : vector<8x256xf32>
    %31 = vector.extract_strided_slice %1 {offsets = [0, 7], sizes = [8, 1], strides = [1, 1]} : vector<8x9xf32> to vector<8x1xf32>
    %32 = vector.broadcast %31 : vector<8x1xf32> to vector<8x256xf32>
    %33 = arith.mulf %2, %32 : vector<8x256xf32>
    %34 = arith.addf %30, %33 : vector<8x256xf32>
    %35 = vector.extract_strided_slice %1 {offsets = [0, 8], sizes = [8, 1], strides = [1, 1]} : vector<8x9xf32> to vector<8x1xf32>
    %36 = vector.broadcast %35 : vector<8x1xf32> to vector<8x256xf32>
    %37 = arith.mulf %3, %36 : vector<8x256xf32>
    %38 = arith.addf %34, %37 : vector<8x256xf32>
    %c224_i32 = arith.constant 224 : i32
    %39 = tpu.dynamic_rotate %38 by %c224_i32 dim 1 : vector<8x256xf32>, i32 -> vector<8x256xf32>
    %40 = arith.addf %27, %39 : vector<8x256xf32>
    %c0_3 = arith.constant 0 : index
    %c0_4 = arith.constant 0 : index
    %41 = vector.load %arg3[%c0_3, %c0_4] : memref<8x1xf32, #tpu.memory_space<vmem>>, vector<8x1xf32>
    %42 = vector.broadcast %41 : vector<8x1xf32> to vector<8x256xf32>
    %43 = arith.addf %40, %42 : vector<8x256xf32>
    %cst = arith.constant 0.000000e+00 : f32
    %44 = vector.broadcast %cst : f32 to vector<8x256xf32>
    %45 = arith.maximumf %43, %44 : vector<8x256xf32>
    %c0_5 = arith.constant 0 : index
    %c0_6 = arith.constant 0 : index
    %46 = vector.load %arg4[%c0_5, %c0_6] : memref<16x8xf32, #tpu.memory_space<vmem>>, vector<16x8xf32>
    %cst_7 = arith.constant dense<0.000000e+00> : vector<16x256xf32>
    %47 = tpu.matmul %46, %45, %cst_7 {dimension_numbers = #tpu.dot_dimension_numbers<[1], [0], [0], [1], [0, 0, 1, 1], [], []>} : vector<16x8xf32>, vector<8x256xf32>, vector<16x256xf32> -> vector<16x256xf32>
    %c0_8 = arith.constant 0 : index
    %c0_9 = arith.constant 0 : index
    %48 = vector.load %arg5[%c0_8, %c0_9] : memref<16x1xf32, #tpu.memory_space<vmem>>, vector<16x1xf32>
    %49 = vector.broadcast %48 : vector<16x1xf32> to vector<16x256xf32>
    %50 = arith.addf %47, %49 : vector<16x256xf32>
    %cst_10 = arith.constant 0.000000e+00 : f32
    %51 = vector.broadcast %cst_10 : f32 to vector<16x256xf32>
    %52 = arith.maximumf %50, %51 : vector<16x256xf32>
    %c0_11 = arith.constant 0 : index
    %c0_12 = arith.constant 0 : index
    %53 = vector.load %arg6[%c0_11, %c0_12] : memref<16x256xf32, #tpu.memory_space<vmem>>, vector<16x256xf32>
    tpu.vector_store %arg6[%c0_11, %c0_12], %52 {strides = array<i32>} : memref<16x256xf32, #tpu.memory_space<vmem>>, vector<16x256xf32>,
    return
  }
  func.func @transform_0(%arg0: i32) -> (i32, i32) {
    %c0_i32 = arith.constant 0 : i32
    %c0_i32_0 = arith.constant 0 : i32
    return %arg0, %c0_i32 : i32, i32
  }
  func.func @transform_1(%arg0: i32) -> (i32, i32) {
    %c0_i32 = arith.constant 0 : i32
    %c0_i32_0 = arith.constant 0 : i32
    %c0_i32_1 = arith.constant 0 : i32
    return %c0_i32, %c0_i32_0 : i32, i32
  }
  func.func @transform_2(%arg0: i32) -> (i32, i32) {
    %c0_i32 = arith.constant 0 : i32
    %c0_i32_0 = arith.constant 0 : i32
    %c0_i32_1 = arith.constant 0 : i32
    return %c0_i32, %c0_i32_0 : i32, i32
  }
  func.func @transform_3(%arg0: i32) -> (i32, i32) {
    %c0_i32 = arith.constant 0 : i32
    %c0_i32_0 = arith.constant 0 : i32
    %c0_i32_1 = arith.constant 0 : i32
    return %c0_i32, %c0_i32_0 : i32, i32
  }
  func.func @transform_4(%arg0: i32) -> (i32, i32) {
    %c0_i32 = arith.constant 0 : i32
    %c0_i32_0 = arith.constant 0 : i32
    %c0_i32_1 = arith.constant 0 : i32
    return %c0_i32, %c0_i32_0 : i32, i32
  }
  func.func @transform_5(%arg0: i32) -> (i32, i32) {
    %c0_i32 = arith.constant 0 : i32
    %c0_i32_0 = arith.constant 0 : i32
    return %arg0, %c0_i32 : i32, i32
  }
}

</mosaic_0001>

<bundles_post_ra>
// kernel: tpu_custom_call.1
= control target key start
LH: loop header
LB: loop body
LE: loop exit
PB: predicated region body
PF: predicated region fallthrough
CT: control target
= control target key end

     0   :  { %v287_v2 = vmov 3   ;;  %s288_s22 = smov 127   ;;  %v289_v3 = vmov 5   ;;  %s380_s0 = inlined_call_operand.vmem [shape: f32[8,256], index: 0, kind: input, shape index: {}]   ;;  %s381_s1 = inlined_call_operand.vmem [shape: f32[8,9], index: 1, kind: input, shape index: {}]   ;;  %s382_s2 = inlined_call_operand.vmem [shape: f32[8,1], index: 2, kind: input, shape index: {}]   ;;  %s383_s3 = inlined_call_operand.vmem [shape: f32[16,8], index: 3, kind: input, shape index: {}]   ;;  %s384_s4 = inlined_call_operand.vmem [shape: f32[16,1], index: 4, kind: input, shape index: {}]   ;;  %s385_s5 = inlined_call_operand.hbm [shape: f32[16,256], index: 5, kind: output, shape index: {}]  }
   0x1   :  { %v336_v0 = vld [vmem:[%s380_s0] sm:$0xff]  ;;  %250 = vset.pattern.permute.xlu1 %v287_v2  ;;  %252 = vset.pattern.permute.xlu0 %v289_v3 }
   0x2   :  { %v23_v1 = vld [vmem:[%s381_s1] sm:$0xff]  ;;  %24 = vrot.lane.b32.xlu0 %v336_v0, %s288_s22 }
   0x3   :  { %64 = vperm.xlu1 %250, %v23_v1  }
   0x4   :  { %10 = vsyncpa [#allocation3], 0  ;;  %s290_s23 = smov 126   ;;  %v291_v4 = vmov 7   ;;  %v346_v5 = vld [vmem:[%s380_s0 + $0x8] sm:$0xff]  ;;  %v292_v6 = vmov 4   ;;  %v28_v12 = vlaneseq }
   0x5   :  { %33 = vrot.lane.b32.xlu2 %v336_v0, %s290_s23  ;;  %v293_v7 = vmov 6   ;;  %v294_v8 = vmov 1   ;;  %v295_v9 = vmov 0   ;;  %v296_v10 = vmov 8   ;;  %s298_s0 = smov 112   ;;  %v125_v39 = vld [vmem:[%s382_s2] sm:$0xff] }
   0x6   :  { %254 = vset.pattern.permute.xlu2 %v291_v4  ;;  %v297_v11 = vmov 2   ;;  %v350_v16 = vand.u32 127, %v28_v12  ;;  %s299_s27 = smov 96   ;;  %v137_v60 = vld [vmem:[%s384_s4] sm:$0xff]  ;;  %v138_v63 = vld [vmem:[%s384_s4 + $0x8] sm:$0xff]  ;;  %vm149_vm4 = vcmask 64512  }
   0x7   :  { %s216_s12 = sshll.u32 %s385_s5, 4  ;;  %s301_s13 = smov 256   ;;  %s217_s12 = int_to_ptr.hbm [resolvable:$true] %s216_s12 }
   0x8   :  { %vm30_vm0 = vcmp.lt.s32.totalorder %v350_v16, 127  ;;  %vm37_vm1 = vcmp.lt.s32.totalorder %v350_v16, 126  ;;  %vm89_vm2 = vcmp.lt.s32.totalorder %v350_v16, 112  ;;  %vm120_vm3 = vcmp.lt.s32.totalorder %v350_v16, 96  ;;  %v136_v16 = vld [vmem:[%s383_s3 + $0x8] sm:$0xff]  ;;  %s302_s14 = smov 16  }
   0xa   :  { %26 = vrot.lane.b32.xlu0 %v346_v5, %s288_s22 }
   0xb   :  { %251 = vset.pattern.permute.xlu1 %v292_v6 }
   0xc   :  { %70 = vperm.xlu1 %251, %v23_v1  }
   0xd   :  { %35 = vrot.lane.b32.xlu2 %v346_v5, %s290_s23 }
  0x12   :  { %78 = vperm.xlu0 %252, %v23_v1  }
  0x14   :  { %253 = vset.pattern.permute.xlu1 %v293_v7 }
  0x15   :  { %101 = vperm.xlu2 %254, %v23_v1   ;;  %95 = vperm.xlu1 %253, %v23_v1  }
  0x1a   :  { %257 = vset.pattern.permute.xlu0 %v294_v8 }
  0x1b   :  { %48 = vperm.xlu0 %257, %v23_v1  }
  0x1d   :  { %256 = vset.pattern.permute.xlu2 %v295_v9  ;;  %255 = vset.pattern.permute.xlu1 %v296_v10 }
  0x1e   :  { %42 = vperm.xlu2 %256, %v23_v1   ;;  %109 = vperm.xlu1 %255, %v23_v1  }
  0x23   :  { %260 = vset.pattern.permute.xlu0 %v295_v9 }
  0x26   :  { %258 = vset.pattern.permute.xlu1 %v297_v11 }
  0x27   :  { %56 = vperm.xlu1 %258, %v23_v1  }
  0x2f   :  { %259 = vset.pattern.permute.xlu1 %v295_v9 }
  0x5f   :  { %v34_v15 = vpop.permute.xlu2 %33 }
  0x67   :  { %v36_v21 = vpop.permute.xlu2 %35 }
  0x68   :  { %v38_v26 = vsel %vm37_vm1, %v34_v15, %v36_v21  ;;  %v39_v27 = vsel %vm37_vm1, %v36_v21, %v34_v15 }
  0x6f   :  { %v102_v36 = vpop.permute.xlu2 %101 }
  0x74   :  { %v25_v13 = vpop.permute.xlu0 %24 }
  0x75   :  { %v65_v14 = vpop.permute.xlu1 %64 }
  0x76   :  { %v67_v24 = vmul.f32 %v65_v14, %v336_v0  ;;  %v68_v25 = vmul.f32 %v65_v14, %v346_v5 }
  0x78   :  { %v43_v47 = vpop.permute.xlu2 %42 }
  0x79   :  { %v45_v51 = vmul.f32 %v43_v47, %v336_v0  ;;  %v46_v52 = vmul.f32 %v43_v47, %v346_v5 }
  0x7c   :  { %v27_v17 = vpop.permute.xlu0 %26 }
  0x7d   :  { %v31_v18 = vsel %vm30_vm0, %v25_v13, %v27_v17  ;;  %v32_v19 = vsel %vm30_vm0, %v27_v17, %v25_v13 }
  0x7e   :  { %v71_v20 = vpop.permute.xlu1 %70  ;;  %v104_v40 = vmul.f32 %v102_v36, %v31_v18  ;;  %v105_v41 = vmul.f32 %v102_v36, %v32_v19 }
  0x7f   :  { %v73_v22 = vmul.f32 %v71_v20, %v31_v18  ;;  %v74_v23 = vmul.f32 %v71_v20, %v32_v19 }
  0x81   :  { %v75_v29 = vadd.f32 %v73_v22, %v67_v24  ;;  %v76_v30 = vadd.f32 %v74_v23, %v68_v25 }
  0x84   :  { %v79_v28 = vpop.permute.xlu0 %78 }
  0x85   :  { %v81_v31 = vmul.f32 %v79_v28, %v38_v26  ;;  %v82_v32 = vmul.f32 %v79_v28, %v39_v27 }
  0x87   :  { %v83_v33 = vadd.f32 %v81_v31, %v75_v29  ;;  %v84_v34 = vadd.f32 %v82_v32, %v76_v30  ;;  %v96_v35 = vpop.permute.xlu1 %95 }
  0x88   :  { %v98_v37 = vmul.f32 %v96_v35, %v336_v0  ;;  %v99_v38 = vmul.f32 %v96_v35, %v346_v5 }
  0x89   :  { %87 = vrot.lane.b32.xlu1 %v84_v34, %s298_s0  ;;  %85 = vrot.lane.b32.xlu2 %v83_v33, %s298_s0 }
  0x8a   :  { %v106_v43 = vadd.f32 %v104_v40, %v98_v37  ;;  %v107_v44 = vadd.f32 %v105_v41, %v99_v38 }
  0x8d   :  { %v49_v48 = vpop.permute.xlu0 %48 }
  0x8e   :  { %v51_v53 = vmul.f32 %v49_v48, %v31_v18  ;;  %v52_v54 = vmul.f32 %v49_v48, %v32_v19  ;;  %v135_v18 = vld [vmem:[%s383_s3] sm:$0xff]  ;;  %s300_s3 = smov [#allocation2]  }
  0x8f   :  { %s214_s9 = sshll.u32 %s300_s3, 4  ;;  %s215_s9 = int_to_ptr.vmem [resolvable:$true] %s214_s9 }
  0x90   :  { %v110_v42 = vpop.permute.xlu1 %109  ;;  %v53_v56 = vadd.f32 %v51_v53, %v45_v51  ;;  %v54_v57 = vadd.f32 %v52_v54, %v46_v52 }
  0x91   :  { %v112_v45 = vmul.f32 %v110_v42, %v38_v26  ;;  %v113_v46 = vmul.f32 %v110_v42, %v39_v27  ;;  %128 = vperm.xlu1 %259, %v125_v39  }
  0x93   :  { %v114_v49 = vadd.f32 %v112_v45, %v106_v43  ;;  %v115_v50 = vadd.f32 %v113_v46, %v107_v44 }
  0x95   :  { %118 = vrot.lane.b32.xlu0 %v115_v50, %s299_s27  ;;  %116 = vrot.lane.b32.xlu2 %v114_v49, %s299_s27 }
  0x99   :  { %v57_v55 = vpop.permute.xlu1 %56 }
  0x9a   :  { %v59_v58 = vmul.f32 %v57_v55, %v38_v26  ;;  %v60_v59 = vmul.f32 %v57_v55, %v39_v27 }
  0x9c   :  { %v61_v61 = vadd.f32 %v59_v58, %v53_v56  ;;  %v62_v62 = vadd.f32 %v60_v59, %v54_v57 }
  0x9d   :  { %141 = vperm.xlu2 %256, %v137_v60   ;;  %146 = vperm.xlu0 %260, %v138_v63  }
  0xe3   :  { %v86_v0 = vpop.permute.xlu2 %85 }
  0xef   :  { %v117_v4 = vpop.permute.xlu2 %116 }
  0xf7   :  { %v142_v19 = vpop.permute.xlu2 %141 }
  0xfb   :  { %v88_v1 = vpop.permute.xlu1 %87 }
  0xfc   :  { %v90_v2 = vsel %vm89_vm2, %v86_v0, %v88_v1  ;;  %v91_v3 = vsel %vm89_vm2, %v88_v1, %v86_v0 }
  0xfd   :  { %v92_v5 = vadd.f32 %v90_v2, %v61_v61  ;;  %v93_v6 = vadd.f32 %v91_v3, %v62_v62 }
 0x103   :  { %v129_v10 = vpop.permute.xlu1 %128 }
 0x107   :  { %v119_v7 = vpop.permute.xlu0 %118 }
 0x108   :  { %v121_v8 = vsel %vm120_vm3, %v117_v4, %v119_v7  ;;  %v122_v9 = vsel %vm120_vm3, %v119_v7, %v117_v4 }
 0x109   :  { %v123_v11 = vadd.f32 %v121_v8, %v92_v5  ;;  %v124_v12 = vadd.f32 %v122_v9, %v93_v6 }
 0x10b   :  { %v131_v13 = vadd.f32 %v129_v10, %v123_v11  ;;  %v132_v14 = vadd.f32 %v129_v10, %v124_v12 }
 0x10d   :  { %v133_v15 = vmax.f32 %v131_v13, 0.0  ;;  %v134_v17 = vmax.f32 %v132_v14, 0.0 }
 0x10f   :  { %171 = vmatpush.msra.mxu0 %v133_v15  ;;  %232 = vmatpush.msra.mxu2 %v133_v15  ;;  %v147_v26 = vpop.permute.xlu0 %146 }
 0x110   :  { %194 = vmatpush.msra.mxu1 %v134_v17  ;;  %233 = vmatpush.msra.mxu3 %v134_v17 }
 0x111   :  { %228 = vmatmul.msk.f32.vlgmr.msra.gmra.mxu0 %vm149_vm4, %v135_v18  ;;  %229 = vmatmul.msk.f32.vlgmr.msra.gmra.mxu2 %vm149_vm4, %v136_v16 }
 0x112   :  { %230 = vmatmul.msk.f32.vlgmr.msra.gmra.mxu1 %vm149_vm4, %v135_v18  ;;  %231 = vmatmul.msk.f32.vlgmr.msra.gmra.mxu3 %vm149_vm4, %v136_v16 }
 0x18e   :  { %v173_v20 = vpop.f32.mrf.mxu0 }
 0x18f   :  { %v174_v21 = vadd.f32 %v173_v20, %v142_v19  ;;  %v196_v22 = vpop.f32.mrf.mxu1 }
 0x190   :  { %v197_v23 = vadd.f32 %v196_v22, %v142_v19 }
 0x191   :  { %v202_v24 = vmax.f32 %v174_v21, 0.0 }
 0x192   :  { %v203_v25 = vmax.f32 %v197_v23, 0.0 }
 0x193   :  { %206 = vst [vmem:[#allocation2] sm:$0xff] %v202_v24 }
 0x194   :  { %207 = vst [vmem:[#allocation2 + $0x8] sm:$0xff] %v203_v25  ;;  %v176_v27 = vpop.f32.mrf.mxu2 }
 0x195   :  { %v177_v28 = vadd.f32 %v176_v27, %v147_v26  ;;  %v199_v29 = vpop.f32.mrf.mxu3 }
 0x196   :  { %v200_v30 = vadd.f32 %v199_v29, %v147_v26 }
 0x197   :  { %v204_v31 = vmax.f32 %v177_v28, 0.0 }
 0x198   :  { %v205_v32 = vmax.f32 %v200_v30, 0.0 }
 0x199   :  { %208 = vst [vmem:[#allocation2 + $0x10] sm:$0xff] %v204_v31 }
 0x19a   :  { %209 = vst [vmem:[#allocation2 + $0x18] sm:$0xff] %v205_v32 }
 0x19b   :  { %222 = dma.vmem_to_hbm [thread:$0]  %s215_s9, 512, %s217_s12, [#allocation3], %s301_s13, %s301_s13, %s302_s14  }
 0x19c   :  { %285 = dma.done.wait [#allocation3], 512  }
 0x19d   :  { %286 = vsyncadd [#allocation3], 4294966784 }
 0x19e   :  { %227 = vsyncpa [#allocation3], 1 }

</bundles_post_ra>
